<compile_context>
chip_gen: v7x
topology: tpu7x:2x2x1
jax: 0.10.0
libtpu: 0.0.40
codegen_flags: <defaults>
</compile_context>

<pallas_src>
import functools

import jax
import jax.numpy as jnp
from jax.experimental import pallas as pl
from jax.experimental.pallas import tpu as pltpu


def _conv2d_im2col_kernel(x_ref, w_ref, b_ref, o_ref, *,
                          H, W, KH, KW, Cin, Cpad, Nb):
    """Nb images per grid step, single fused im2col matmul, no VMEM scratch.

    x_ref : (Nb, Cin, H*W)        flattened NCHW input (lane-dense)
    w_ref : (Cout, KH*KW*Cpad)    weights, channel dim zero-padded to Cpad
    b_ref : (Cout, 1)             bias (lane-broadcast VPU add after the dot)
    o_ref : (Nb, Cout, H*W)       flattened NCHW output (lane-dense)
    """
    HW = H * W
    hh, hwf = KH // 2, KW // 2

    # Per-lane (row, col) within one image — static, 2 int32 vregs.
    lane = jax.lax.broadcasted_iota(jnp.int32, (1, HW), 1)
    if (W & (W - 1)) == 0:                       # power-of-two width fast path
        col = jnp.bitwise_and(lane, W - 1)
        row = jnp.right_shift(lane, int(W).bit_length() - 1)
    else:
        col = jax.lax.rem(lane, W)
        row = jax.lax.div(lane, W)

    # Validity mask per tap (None when the tap never leaves the image).
    # Out-of-image positions (including roll wrap-around / cross-image lanes)
    # are exactly the masked ones, so they read garbage-but-masked-to-zero.
    masks = {}
    for kh in range(KH):
        dh = kh - hh
        for kw in range(KW):
            dw = kw - hwf
            m = None
            if dh != 0:
                m = (row + dh >= 0) & (row + dh < H)
            if dw != 0:
                c_ok = (col + dw >= 0) & (col + dw < W)
                m = c_ok if m is None else (m & c_ok)
            masks[(dh, dw)] = m

    zero_rows = (jnp.zeros((Cpad - Cin, HW), jnp.float32)
                 if Cpad > Cin else None)

    per_image = []
    for n_local in range(Nb):
        x2d = x_ref[n_local].astype(jnp.float32)            # (Cin, HW)
        if zero_rows is not None:                            # sublane-align to 8
            x2d = jnp.concatenate([x2d, zero_rows], axis=0)  # (Cpad, HW)
        taps = []
        for kh in range(KH):
            dh = kh - hh
            for kw in range(KW):
                dw = kw - hwf
                d = dh * W + dw                              # static flat offset
                shift = (-d) % HW
                tap = x2d if shift == 0 else pltpu.roll(x2d, shift, axis=1)
                m = masks[(dh, dw)]
                if m is not None:
                    tap = jnp.where(m, tap, 0.0)
                taps.append(tap)
        per_image.append(jnp.concatenate(taps, axis=0))      # (KH*KW*Cpad, HW)

    patch = per_image[0] if Nb == 1 else jnp.concatenate(per_image, axis=1)

    # One MXU pass (Cout, K) @ (K, Nb*HW), f32 accumulation, then bias add.
    out = jnp.dot(w_ref[...], patch, preferred_element_type=jnp.float32)
    out = out + b_ref[...]                                   # (Cout,1) broadcast

    if Nb == 1:
        o_ref[0] = out.astype(o_ref.dtype)
    else:
        for n_local in range(Nb):                            # lane-aligned slices
            o_ref[n_local] = out[:, n_local * HW:(n_local + 1) * HW].astype(
                o_ref.dtype)


@jax.jit
def esnac_layer_forward(x_nchw, weight, bias):
    """ESNACLayer.forward with base = Conv2d(Cin, Cout, 3, stride=1, padding=1).

    x_nchw: (N, Cin, H, W)   weight: (Cout, Cin, KH, KW)   bias: (Cout,)
    returns (N, Cout, H, W)  -- identical layout/semantics to the PyTorch module.
    """
    N, Cin, H, W = x_nchw.shape
    Cout, _, KH, KW = weight.shape
    HW = H * W
    Cpad = ((Cin + 7) // 8) * 8                  # sublane-aligned channel count
    K = KH * KW * Cpad

    # Nb images per grid step; keep >= 2 grid steps so ("parallel",) maps one
    # block per TensorCore on v7x (single-TC v5e/v6e just amortise step cost).
    Nb = max(1, pl.cdiv(N, 2))
    G = pl.cdiv(N, Nb)
    Npad = G * Nb

    # Free reshape: spatial onto the 128-lane axis, NCHW order preserved.
    x_flat = x_nchw.reshape(N, Cin, HW)
    if Npad != N:
        x_flat = jnp.pad(x_flat, ((0, Npad - N), (0, 0), (0, 0)))

    # (Cout, Cin, KH, KW) -> (Cout, KH*KW*Cpad) in (kh, kw, c) patch-row order,
    # with the channel axis zero-padded to the 8-sublane tile.
    w_mat = jnp.transpose(weight, (0, 2, 3, 1))              # (Cout,KH,KW,Cin)
    w_mat = jnp.pad(w_mat, ((0, 0), (0, 0), (0, 0), (0, Cpad - Cin)))
    w_mat = w_mat.reshape(Cout, K)

    bias2d = bias.reshape(Cout, 1).astype(jnp.float32)

    kernel = functools.partial(_conv2d_im2col_kernel, H=H, W=W, KH=KH, KW=KW,
                               Cin=Cin, Cpad=Cpad, Nb=Nb)

    out_flat = pl.pallas_call(
        kernel,
        out_shape=jax.ShapeDtypeStruct((Npad, Cout, HW), x_nchw.dtype),
        grid_spec=pltpu.PrefetchScalarGridSpec(
            num_scalar_prefetch=0,
            grid=(G,),
            in_specs=[
                pl.BlockSpec((Nb, Cin, HW), lambda n: (n, 0, 0)),
                pl.BlockSpec((Cout, K), lambda n: (0, 0)),
                pl.BlockSpec((Cout, 1), lambda n: (0, 0)),
            ],
            out_specs=pl.BlockSpec((Nb, Cout, HW), lambda n: (n, 0, 0)),
        ),
        compiler_params=pltpu.CompilerParams(
            dimension_semantics=("parallel",)),   # shards batch over 2 TCs (v7x)
    )(x_flat, w_mat, bias2d)

    # Free reshape back to NCHW (output was computed lane-dense as (Cout, H*W)).
    return out_flat[:N].reshape(N, Cout, H, W)


if __name__ == "__main__":
    key = jax.random.PRNGKey(0)
    k_x, k_w, k_b = jax.random.split(key, 3)

    # ESNACLayer wrapping Conv2d(in=4, out=8, kernel_size=3, padding=1),
    # in_shape = (-1, 4, 16, 16), out_shape = (-1, 8, 16, 16).
    N, Cin, H, W, Cout = 2, 4, 16, 16, 8

    x = jax.random.normal(k_x, (N, Cin, H, W), dtype=jnp.float32)
    weight = jax.random.normal(k_w, (Cout, Cin, 3, 3), dtype=jnp.float32) * 0.1
    bias = jax.random.normal(k_b, (Cout,), dtype=jnp.float32) * 0.1

    out = jax.block_until_ready(esnac_layer_forward(x, weight, bias))

    # Reference check against XLA conv (same semantics as torch Conv2d).
    ref = jax.lax.conv_general_dilated(
        x, weight, window_strides=(1, 1), padding="SAME",
        dimension_numbers=("NCHW", "OIHW", "NCHW"),
    ) + bias.reshape(1, Cout, 1, 1)
    assert out.shape == (N, Cout, H, W)
    assert jnp.allclose(out, ref, atol=1e-4, rtol=1e-4), \
        float(jnp.max(jnp.abs(out - ref)))

    print("KERNEL_OK")
</pallas_src>

<mosaic_0001>
module attributes {stable_mosaic.version = 11 : i64} {
  func.func @_conv2d_im2col_kernel(%arg0: i32, %arg1: memref<1x4x256xf32, #tpu.memory_space<vmem>>, %arg2: memref<8x72xf32, #tpu.memory_space<vmem>>, %arg3: memref<8x1xf32, #tpu.memory_space<vmem>>, %arg4: memref<1x8x256xf32, #tpu.memory_space<vmem>>) attributes {dimension_semantics = [#tpu.dimension_semantics<parallel>], iteration_bounds = array<i64: 2>, scalar_prefetch = 0 : i64, scratch_operands = 0 : i64, tpu.core_type = #tpu.core_type<tc>, window_params = [{transform_indices = @transform_0, window_bounds = array<i64: 1, 4, 256>}, {pipeline_mode = #tpu.pipeline_mode<synchronous>, transform_indices = @transform_1, window_bounds = array<i64: 8, 72>}, {pipeline_mode = #tpu.pipeline_mode<synchronous>, transform_indices = @transform_2, window_bounds = array<i64: 8, 1>}, {transform_indices = @transform_3, window_bounds = array<i64: 1, 8, 256>}]} {
    %0 = tpu.iota {dimensions = array<i32: 1>} : vector<1x256xi32>
    %c15_i32 = arith.constant 15 : i32
    %1 = vector.broadcast %c15_i32 : i32 to vector<1x256xi32>
    %2 = arith.andi %0, %1 : vector<1x256xi32>
    %c4_i32 = arith.constant 4 : i32
    %3 = vector.broadcast %c4_i32 : i32 to vector<1x256xi32>
    %4 = arith.shrsi %0, %3 : vector<1x256xi32>
    %c-1_i32 = arith.constant -1 : i32
    %5 = vector.broadcast %c-1_i32 : i32 to vector<1x256xi32>
    %6 = arith.addi %4, %5 : vector<1x256xi32>
    %c0_i32 = arith.constant 0 : i32
    %7 = vector.broadcast %c0_i32 : i32 to vector<1x256xi32>
    %8 = arith.cmpi sge, %6, %7 : vector<1x256xi32>
    %c-1_i32_0 = arith.constant -1 : i32
    %9 = vector.broadcast %c-1_i32_0 : i32 to vector<1x256xi32>
    %10 = arith.addi %4, %9 : vector<1x256xi32>
    %c16_i32 = arith.constant 16 : i32
    %11 = vector.broadcast %c16_i32 : i32 to vector<1x256xi32>
    %12 = arith.cmpi slt, %10, %11 : vector<1x256xi32>
    %13 = arith.andi %8, %12 : vector<1x256xi1>
    %c-1_i32_1 = arith.constant -1 : i32
    %14 = vector.broadcast %c-1_i32_1 : i32 to vector<1x256xi32>
    %15 = arith.addi %2, %14 : vector<1x256xi32>
    %c0_i32_2 = arith.constant 0 : i32
    %16 = vector.broadcast %c0_i32_2 : i32 to vector<1x256xi32>
    %17 = arith.cmpi sge, %15, %16 : vector<1x256xi32>
    %c-1_i32_3 = arith.constant -1 : i32
    %18 = vector.broadcast %c-1_i32_3 : i32 to vector<1x256xi32>
    %19 = arith.addi %2, %18 : vector<1x256xi32>
    %c16_i32_4 = arith.constant 16 : i32
    %20 = vector.broadcast %c16_i32_4 : i32 to vector<1x256xi32>
    %21 = arith.cmpi slt, %19, %20 : vector<1x256xi32>
    %22 = arith.andi %17, %21 : vector<1x256xi1>
    %23 = arith.andi %13, %22 : vector<1x256xi1>
    %c-1_i32_5 = arith.constant -1 : i32
    %24 = vector.broadcast %c-1_i32_5 : i32 to vector<1x256xi32>
    %25 = arith.addi %4, %24 : vector<1x256xi32>
    %c0_i32_6 = arith.constant 0 : i32
    %26 = vector.broadcast %c0_i32_6 : i32 to vector<1x256xi32>
    %27 = arith.cmpi sge, %25, %26 : vector<1x256xi32>
    %c-1_i32_7 = arith.constant -1 : i32
    %28 = vector.broadcast %c-1_i32_7 : i32 to vector<1x256xi32>
    %29 = arith.addi %4, %28 : vector<1x256xi32>
    %c16_i32_8 = arith.constant 16 : i32
    %30 = vector.broadcast %c16_i32_8 : i32 to vector<1x256xi32>
    %31 = arith.cmpi slt, %29, %30 : vector<1x256xi32>
    %32 = arith.andi %27, %31 : vector<1x256xi1>
    %c-1_i32_9 = arith.constant -1 : i32
    %33 = vector.broadcast %c-1_i32_9 : i32 to vector<1x256xi32>
    %34 = arith.addi %4, %33 : vector<1x256xi32>
    %c0_i32_10 = arith.constant 0 : i32
    %35 = vector.broadcast %c0_i32_10 : i32 to vector<1x256xi32>
    %36 = arith.cmpi sge, %34, %35 : vector<1x256xi32>
    %c-1_i32_11 = arith.constant -1 : i32
    %37 = vector.broadcast %c-1_i32_11 : i32 to vector<1x256xi32>
    %38 = arith.addi %4, %37 : vector<1x256xi32>
    %c16_i32_12 = arith.constant 16 : i32
    %39 = vector.broadcast %c16_i32_12 : i32 to vector<1x256xi32>
    %40 = arith.cmpi slt, %38, %39 : vector<1x256xi32>
    %41 = arith.andi %36, %40 : vector<1x256xi1>
    %c1_i32 = arith.constant 1 : i32
    %42 = vector.broadcast %c1_i32 : i32 to vector<1x256xi32>
    %43 = arith.addi %2, %42 : vector<1x256xi32>
    %c0_i32_13 = arith.constant 0 : i32
    %44 = vector.broadcast %c0_i32_13 : i32 to vector<1x256xi32>
    %45 = arith.cmpi sge, %43, %44 : vector<1x256xi32>
    %c1_i32_14 = arith.constant 1 : i32
    %46 = vector.broadcast %c1_i32_14 : i32 to vector<1x256xi32>
    %47 = arith.addi %2, %46 : vector<1x256xi32>
    %c16_i32_15 = arith.constant 16 : i32
    %48 = vector.broadcast %c16_i32_15 : i32 to vector<1x256xi32>
    %49 = arith.cmpi slt, %47, %48 : vector<1x256xi32>
    %50 = arith.andi %45, %49 : vector<1x256xi1>
    %51 = arith.andi %41, %50 : vector<1x256xi1>
    %c-1_i32_16 = arith.constant -1 : i32
    %52 = vector.broadcast %c-1_i32_16 : i32 to vector<1x256xi32>
    %53 = arith.addi %2, %52 : vector<1x256xi32>
    %c0_i32_17 = arith.constant 0 : i32
    %54 = vector.broadcast %c0_i32_17 : i32 to vector<1x256xi32>
    %55 = arith.cmpi sge, %53, %54 : vector<1x256xi32>
    %c-1_i32_18 = arith.constant -1 : i32
    %56 = vector.broadcast %c-1_i32_18 : i32 to vector<1x256xi32>
    %57 = arith.addi %2, %56 : vector<1x256xi32>
    %c16_i32_19 = arith.constant 16 : i32
    %58 = vector.broadcast %c16_i32_19 : i32 to vector<1x256xi32>
    %59 = arith.cmpi slt, %57, %58 : vector<1x256xi32>
    %60 = arith.andi %55, %59 : vector<1x256xi1>
    %c1_i32_20 = arith.constant 1 : i32
    %61 = vector.broadcast %c1_i32_20 : i32 to vector<1x256xi32>
    %62 = arith.addi %2, %61 : vector<1x256xi32>
    %c0_i32_21 = arith.constant 0 : i32
    %63 = vector.broadcast %c0_i32_21 : i32 to vector<1x256xi32>
    %64 = arith.cmpi sge, %62, %63 : vector<1x256xi32>
    %c1_i32_22 = arith.constant 1 : i32
    %65 = vector.broadcast %c1_i32_22 : i32 to vector<1x256xi32>
    %66 = arith.addi %2, %65 : vector<1x256xi32>
    %c16_i32_23 = arith.constant 16 : i32
    %67 = vector.broadcast %c16_i32_23 : i32 to vector<1x256xi32>
    %68 = arith.cmpi slt, %66, %67 : vector<1x256xi32>
    %69 = arith.andi %64, %68 : vector<1x256xi1>
    %c1_i32_24 = arith.constant 1 : i32
    %70 = vector.broadcast %c1_i32_24 : i32 to vector<1x256xi32>
    %71 = arith.addi %4, %70 : vector<1x256xi32>
    %c0_i32_25 = arith.constant 0 : i32
    %72 = vector.broadcast %c0_i32_25 : i32 to vector<1x256xi32>
    %73 = arith.cmpi sge, %71, %72 : vector<1x256xi32>
    %c1_i32_26 = arith.constant 1 : i32
    %74 = vector.broadcast %c1_i32_26 : i32 to vector<1x256xi32>
    %75 = arith.addi %4, %74 : vector<1x256xi32>
    %c16_i32_27 = arith.constant 16 : i32
    %76 = vector.broadcast %c16_i32_27 : i32 to vector<1x256xi32>
    %77 = arith.cmpi slt, %75, %76 : vector<1x256xi32>
    %78 = arith.andi %73, %77 : vector<1x256xi1>
    %c-1_i32_28 = arith.constant -1 : i32
    %79 = vector.broadcast %c-1_i32_28 : i32 to vector<1x256xi32>
    %80 = arith.addi %2, %79 : vector<1x256xi32>
    %c0_i32_29 = arith.constant 0 : i32
    %81 = vector.broadcast %c0_i32_29 : i32 to vector<1x256xi32>
    %82 = arith.cmpi sge, %80, %81 : vector<1x256xi32>
    %c-1_i32_30 = arith.constant -1 : i32
    %83 = vector.broadcast %c-1_i32_30 : i32 to vector<1x256xi32>
    %84 = arith.addi %2, %83 : vector<1x256xi32>
    %c16_i32_31 = arith.constant 16 : i32
    %85 = vector.broadcast %c16_i32_31 : i32 to vector<1x256xi32>
    %86 = arith.cmpi slt, %84, %85 : vector<1x256xi32>
    %87 = arith.andi %82, %86 : vector<1x256xi1>
    %88 = arith.andi %78, %87 : vector<1x256xi1>
    %c1_i32_32 = arith.constant 1 : i32
    %89 = vector.broadcast %c1_i32_32 : i32 to vector<1x256xi32>
    %90 = arith.addi %4, %89 : vector<1x256xi32>
    %c0_i32_33 = arith.constant 0 : i32
    %91 = vector.broadcast %c0_i32_33 : i32 to vector<1x256xi32>
    %92 = arith.cmpi sge, %90, %91 : vector<1x256xi32>
    %c1_i32_34 = arith.constant 1 : i32
    %93 = vector.broadcast %c1_i32_34 : i32 to vector<1x256xi32>
    %94 = arith.addi %4, %93 : vector<1x256xi32>
    %c16_i32_35 = arith.constant 16 : i32
    %95 = vector.broadcast %c16_i32_35 : i32 to vector<1x256xi32>
    %96 = arith.cmpi slt, %94, %95 : vector<1x256xi32>
    %97 = arith.andi %92, %96 : vector<1x256xi1>
    %c1_i32_36 = arith.constant 1 : i32
    %98 = vector.broadcast %c1_i32_36 : i32 to vector<1x256xi32>
    %99 = arith.addi %4, %98 : vector<1x256xi32>
    %c0_i32_37 = arith.constant 0 : i32
    %100 = vector.broadcast %c0_i32_37 : i32 to vector<1x256xi32>
    %101 = arith.cmpi sge, %99, %100 : vector<1x256xi32>
    %c1_i32_38 = arith.constant 1 : i32
    %102 = vector.broadcast %c1_i32_38 : i32 to vector<1x256xi32>
    %103 = arith.addi %4, %102 : vector<1x256xi32>
    %c16_i32_39 = arith.constant 16 : i32
    %104 = vector.broadcast %c16_i32_39 : i32 to vector<1x256xi32>
    %105 = arith.cmpi slt, %103, %104 : vector<1x256xi32>
    %106 = arith.andi %101, %105 : vector<1x256xi1>
    %c1_i32_40 = arith.constant 1 : i32
    %107 = vector.broadcast %c1_i32_40 : i32 to vector<1x256xi32>
    %108 = arith.addi %2, %107 : vector<1x256xi32>
    %c0_i32_41 = arith.constant 0 : i32
    %109 = vector.broadcast %c0_i32_41 : i32 to vector<1x256xi32>
    %110 = arith.cmpi sge, %108, %109 : vector<1x256xi32>
    %c1_i32_42 = arith.constant 1 : i32
    %111 = vector.broadcast %c1_i32_42 : i32 to vector<1x256xi32>
    %112 = arith.addi %2, %111 : vector<1x256xi32>
    %c16_i32_43 = arith.constant 16 : i32
    %113 = vector.broadcast %c16_i32_43 : i32 to vector<1x256xi32>
    %114 = arith.cmpi slt, %112, %113 : vector<1x256xi32>
    %115 = arith.andi %110, %114 : vector<1x256xi1>
    %116 = arith.andi %106, %115 : vector<1x256xi1>
    %cst = arith.constant 0.000000e+00 : f32
    %117 = vector.broadcast %cst : f32 to vector<4x256xf32>
    %c0 = arith.constant 0 : index
    %c0_44 = arith.constant 0 : index
    %c0_45 = arith.constant 0 : index
    %118 = vector.load %arg1[%c0, %c0_44, %c0_45] : memref<1x4x256xf32, #tpu.memory_space<vmem>>, vector<1x4x256xf32>
    %119 = vector.shape_cast %118 : vector<1x4x256xf32> to vector<4x256xf32>
    %120 = tpu.concatenate %119, %117 in 0 : vector<4x256xf32>, vector<4x256xf32> -> vector<8x256xf32>
    %c17_i32 = arith.constant 17 : i32
    %121 = tpu.dynamic_rotate %120 by %c17_i32 dim 1 : vector<8x256xf32>, i32 -> vector<8x256xf32>
    %cst_46 = arith.constant 0.000000e+00 : f32
    %122 = vector.shape_cast %23 : vector<1x256xi1> to vector<1x256xi1>
    %123 = vector.broadcast %122 : vector<1x256xi1> to vector<8x256xi1>
    %124 = vector.broadcast %cst_46 : f32 to vector<8x256xf32>
    %125 = arith.select %123, %121, %124 : vector<8x256xi1>, vector<8x256xf32>
    %c16_i32_47 = arith.constant 16 : i32
    %126 = tpu.dynamic_rotate %120 by %c16_i32_47 dim 1 : vector<8x256xf32>, i32 -> vector<8x256xf32>
    %cst_48 = arith.constant 0.000000e+00 : f32
    %127 = vector.shape_cast %32 : vector<1x256xi1> to vector<1x256xi1>
    %128 = vector.broadcast %127 : vector<1x256xi1> to vector<8x256xi1>
    %129 = vector.broadcast %cst_48 : f32 to vector<8x256xf32>
    %130 = arith.select %128, %126, %129 : vector<8x256xi1>, vector<8x256xf32>
    %c15_i32_49 = arith.constant 15 : i32
    %131 = tpu.dynamic_rotate %120 by %c15_i32_49 dim 1 : vector<8x256xf32>, i32 -> vector<8x256xf32>
    %cst_50 = arith.constant 0.000000e+00 : f32
    %132 = vector.shape_cast %51 : vector<1x256xi1> to vector<1x256xi1>
    %133 = vector.broadcast %132 : vector<1x256xi1> to vector<8x256xi1>
    %134 = vector.broadcast %cst_50 : f32 to vector<8x256xf32>
    %135 = arith.select %133, %131, %134 : vector<8x256xi1>, vector<8x256xf32>
    %c1_i32_51 = arith.constant 1 : i32
    %136 = tpu.dynamic_rotate %120 by %c1_i32_51 dim 1 : vector<8x256xf32>, i32 -> vector<8x256xf32>
    %cst_52 = arith.constant 0.000000e+00 : f32
    %137 = vector.shape_cast %60 : vector<1x256xi1> to vector<1x256xi1>
    %138 = vector.broadcast %137 : vector<1x256xi1> to vector<8x256xi1>
    %139 = vector.broadcast %cst_52 : f32 to vector<8x256xf32>
    %140 = arith.select %138, %136, %139 : vector<8x256xi1>, vector<8x256xf32>
    %c255_i32 = arith.constant 255 : i32
    %141 = tpu.dynamic_rotate %120 by %c255_i32 dim 1 : vector<8x256xf32>, i32 -> vector<8x256xf32>
    %cst_53 = arith.constant 0.000000e+00 : f32
    %142 = vector.shape_cast %69 : vector<1x256xi1> to vector<1x256xi1>
    %143 = vector.broadcast %142 : vector<1x256xi1> to vector<8x256xi1>
    %144 = vector.broadcast %cst_53 : f32 to vector<8x256xf32>
    %145 = arith.select %143, %141, %144 : vector<8x256xi1>, vector<8x256xf32>
    %c241_i32 = arith.constant 241 : i32
    %146 = tpu.dynamic_rotate %120 by %c241_i32 dim 1 : vector<8x256xf32>, i32 -> vector<8x256xf32>
    %cst_54 = arith.constant 0.000000e+00 : f32
    %147 = vector.shape_cast %88 : vector<1x256xi1> to vector<1x256xi1>
    %148 = vector.broadcast %147 : vector<1x256xi1> to vector<8x256xi1>
    %149 = vector.broadcast %cst_54 : f32 to vector<8x256xf32>
    %150 = arith.select %148, %146, %149 : vector<8x256xi1>, vector<8x256xf32>
    %c240_i32 = arith.constant 240 : i32
    %151 = tpu.dynamic_rotate %120 by %c240_i32 dim 1 : vector<8x256xf32>, i32 -> vector<8x256xf32>
    %cst_55 = arith.constant 0.000000e+00 : f32
    %152 = vector.shape_cast %97 : vector<1x256xi1> to vector<1x256xi1>
    %153 = vector.broadcast %152 : vector<1x256xi1> to vector<8x256xi1>
    %154 = vector.broadcast %cst_55 : f32 to vector<8x256xf32>
    %155 = arith.select %153, %151, %154 : vector<8x256xi1>, vector<8x256xf32>
    %c239_i32 = arith.constant 239 : i32
    %156 = tpu.dynamic_rotate %120 by %c239_i32 dim 1 : vector<8x256xf32>, i32 -> vector<8x256xf32>
    %cst_56 = arith.constant 0.000000e+00 : f32
    %157 = vector.shape_cast %116 : vector<1x256xi1> to vector<1x256xi1>
    %158 = vector.broadcast %157 : vector<1x256xi1> to vector<8x256xi1>
    %159 = vector.broadcast %cst_56 : f32 to vector<8x256xf32>
    %160 = arith.select %158, %156, %159 : vector<8x256xi1>, vector<8x256xf32>
    %161 = tpu.concatenate %125, %130, %135, %140, %120, %145, %150, %155, %160 in 0 : vector<8x256xf32>, vector<8x256xf32>, vector<8x256xf32>, vector<8x256xf32>, vector<8x256xf32>, vector<8x256xf32>, vector<8x256xf32>, vector<8x256xf32>, vector<8x256xf32> -> vector<72x256xf32>
    %c0_57 = arith.constant 0 : index
    %c0_58 = arith.constant 0 : index
    %162 = vector.load %arg2[%c0_57, %c0_58] : memref<8x72xf32, #tpu.memory_space<vmem>>, vector<8x72xf32>
    %cst_59 = arith.constant dense<0.000000e+00> : vector<8x256xf32>
    %163 = tpu.matmul %162, %161, %cst_59 {dimension_numbers = #tpu.dot_dimension_numbers<[1], [0], [0], [1], [0, 0, 1, 1], [], []>} : vector<8x72xf32>, vector<72x256xf32>, vector<8x256xf32> -> vector<8x256xf32>
    %c0_60 = arith.constant 0 : index
    %c0_61 = arith.constant 0 : index
    %164 = vector.load %arg3[%c0_60, %c0_61] : memref<8x1xf32, #tpu.memory_space<vmem>>, vector<8x1xf32>
    %165 = vector.broadcast %164 : vector<8x1xf32> to vector<8x256xf32>
    %166 = arith.addf %163, %165 : vector<8x256xf32>
    %c0_62 = arith.constant 0 : index
    %c0_63 = arith.constant 0 : index
    %c0_64 = arith.constant 0 : index
    %167 = vector.load %arg4[%c0_62, %c0_63, %c0_64] : memref<1x8x256xf32, #tpu.memory_space<vmem>>, vector<1x8x256xf32>
    %168 = vector.shape_cast %167 : vector<1x8x256xf32> to vector<8x256xf32>
    %169 = vector.shape_cast %166 : vector<8x256xf32> to vector<1x8x256xf32>
    tpu.vector_store %arg4[%c0_62, %c0_63, %c0_64], %169 {strides = array<i32>} : memref<1x8x256xf32, #tpu.memory_space<vmem>>, vector<1x8x256xf32>,
    return
  }
  func.func @transform_0(%arg0: i32) -> (i32, i32, i32) {
    %c0_i32 = arith.constant 0 : i32
    %c0_i32_0 = arith.constant 0 : i32
    %c0_i32_1 = arith.constant 0 : i32
    return %arg0, %c0_i32, %c0_i32_0 : i32, i32, i32
  }
  func.func @transform_1(%arg0: i32) -> (i32, i32) {
    %c0_i32 = arith.constant 0 : i32
    %c0_i32_0 = arith.constant 0 : i32
    %c0_i32_1 = arith.constant 0 : i32
    return %c0_i32, %c0_i32_0 : i32, i32
  }
  func.func @transform_2(%arg0: i32) -> (i32, i32) {
    %c0_i32 = arith.constant 0 : i32
    %c0_i32_0 = arith.constant 0 : i32
    %c0_i32_1 = arith.constant 0 : i32
    return %c0_i32, %c0_i32_0 : i32, i32
  }
  func.func @transform_3(%arg0: i32) -> (i32, i32, i32) {
    %c0_i32 = arith.constant 0 : i32
    %c0_i32_0 = arith.constant 0 : i32
    %c0_i32_1 = arith.constant 0 : i32
    return %arg0, %c0_i32, %c0_i32_0 : i32, i32, i32
  }
}

</mosaic_0001>

<bundles_post_ra>
// kernel: esnac_layer_forward.1
= control target key start
LH: loop header
LB: loop body
LE: loop exit
PB: predicated region body
PF: predicated region fallthrough
CT: control target
= control target key end

     0   :  { %s618_s12 = smov 0   ;;  %s826_s0 = inlined_call_operand.vmem [shape: f32[2,4,256], index: 0, kind: input, shape index: {}]   ;;  %s827_s1 = inlined_call_operand.vmem [shape: f32[8,72], index: 1, kind: input, shape index: {}]   ;;  %s828_s2 = inlined_call_operand.vmem [shape: f32[8,1], index: 2, kind: input, shape index: {}]   ;;  %s829_s3 = inlined_call_operand.vmem [shape: f32[2,8,256], index: 3, kind: output, shape index: {}]  }
   0x1 LB: > { %s468_s13 = sadd.s32 4294967295, %s586_s12   ;;  %p472_p0 = scmp.ge.s32.totalorder %s586_s12, 1  ;;  %s586_s12 = sphi %s618_s12, %s13_s12  }
   0x2   : > { %p137_p1 = scmp.lt.s32.totalorder %s586_s12, 3 }
   0x4   : > { %p138_p2 = pnand %p472_p0, %p137_p1 }
   0x5   : > { %p161_p3 = scmp.lt.s32.totalorder (!%p138_p2), %s468_s13, 1  ;;  %vm830_vm0 = vcmask (!%p138_p2), 1043456   ;;  %s588_s18 = smov (!%p138_p2), 15   ;;  %v596_v5 = vmov (!%p138_p2), 0.0   ;;  %v330_v6 = vld [vmem:[%s828_s2] sm:$0xff] (!%p138_p2)  ;;  %v597_v7 = vmov (!%p138_p2), 0   ;;  %v171_v8 = vlaneseq (!%p138_p2) }
   0x6   : > { %141 = sbr.rel (%p138_p2) target bundleno = 380 (0x17c), region = 32  ;;  %s589_s19 = smov (!%p138_p2), 17   ;;  %404 = vmatprep.mubr.f32.mxu0 (!%p138_p2), %v596_v5  ;;  %577 = vset.pattern.permute.xlu1 (!%p138_p2), %v597_v7 }
   0x7   : > { %s590_s20 = smov (!%p138_p2), 1   ;;  %s591_s21 = smov (!%p138_p2), 16   ;;  %578 = vset.pattern.permute.xlu0 (!%p138_p2), %v597_v7  ;;  %v645_v9 = vand.u32 (!%p138_p2), 127, %v171_v8 }
   0x8   : > { %s592_s22 = smov (!%p138_p2), 127   ;;  %s593_s23 = smov (!%p138_p2), 113  }
   0x9   : > { %s594_s24 = smov (!%p138_p2), 112   ;;  %s595_s25 = smov (!%p138_p2), 111   ;;  %v173_v10 = vadd.s32 (!%p138_p2), 128, %v645_v9  ;;  %v176_v11 = vshra.s32 (!%p138_p2), %v645_v9, 4  ;;  %v174_v13 = vand.u32 (!%p138_p2), 15, %v645_v9  ;;  %vm255_vm10 = vcmp.lt.s32.totalorder (!%p138_p2), %v645_v9, 15 }
   0xa   : > { %vm229_vm11 = vcmp.lt.s32.totalorder (!%p138_p2), %v645_v9, 17  ;;  %vm268_vm13 = vcmp.lt.s32.totalorder (!%p138_p2), %v645_v9, 1  ;;  %vm242_vm15 = vcmp.lt.s32.totalorder (!%p138_p2), %v645_v9, 16 }
   0xb   : > { %v177_v12 = vshra.s32 (!%p138_p2), %v173_v10, 4  ;;  %v178_v14 = vadd.s32 (!%p138_p2), 4294967295, %v176_v11  ;;  %v175_v15 = vand.u32 (!%p138_p2), 15, %v173_v10  ;;  %v650_v17 = vadd.s32 (!%p138_p2), 4294967295, %v174_v13 }
   0xc   : > { %v661_v23 = vadd.s32 (!%p138_p2), 1, %v174_v13  ;;  %v206_v34 = vadd.s32 (!%p138_p2), 1, %v176_v11 }
   0xd   : > { %s862_s13 = smov (!%p161_p3, %s468_s13), 1  ;;  %v179_v16 = vadd.s32 4294967295, %v177_v12  ;;  %vm180_vm1 = vcmp.ge.s32.totalorder %v178_v14, 0  ;;  %vm182_vm2 = vcmp.lt.s32.totalorder %v178_v14, 16  ;;  %v652_v18 = vadd.s32 4294967295, %v175_v15 }
   0xe   : > { %s498_s14 = sshll.u32 %s862_s13, 3  ;;  %vm654_vm5 = vmand %vm180_vm1, %vm182_vm2  ;;  %vm831_vm6 = vcmp.ge.s32.totalorder %v650_v17, 0  ;;  %v659_v20 = vadd.s32 1, %v175_v15  ;;  %v207_v25 = vadd.s32 1, %v177_v12  ;;  %vm200_vm1 = vcmp.lt.s32.totalorder %v661_v23, 16  ;;  %s499_s30 = sshll.u32 %s862_s13, 4 }
   0xf   : > { %s165_s17 = scalar_lea.vmem %s826_s0, %s498_s14  ;;  %vm181_vm3 = vcmp.ge.s32.totalorder %v179_v16, 0  ;;  %vm183_vm4 = vcmp.lt.s32.totalorder %v179_v16, 16  ;;  %vm189_vm8 = vcmp.ge.s32.totalorder %v652_v18, 0  ;;  %vm672_vm9 = vmand %vm654_vm5, %vm831_vm6  ;;  %s170_s6 = scalar_lea.vmem %s829_s3, %s499_s30 }
  0x10   : > { %v632_v0 = vld [vmem:[%s165_s17] sm:$0xff]  ;;  %vm663_vm7 = vmand %vm181_vm3, %vm183_vm4  ;;  %vm832_vm12 = vcmp.lt.s32.totalorder %v659_v20, 16  ;;  %vm209_vm4 = vcmp.ge.s32.totalorder %v207_v25, 0 }
  0x11   : > { %v636_v1 = vcombine.high %v632_v0, %v632_v0  ;;  %v223_v2 = vsel %vm830_vm0, %v632_v0, 0.0  ;;  %vm684_vm14 = vmand %vm663_vm7, %vm189_vm8 }
  0x12   : > { %vm702_vm3 = vmand %vm663_vm7, %vm832_vm12  ;;  %vm281_vm12 = vcmp.lt.s32.totalorder %v645_v9, 127 }
  0x13   : > { %v224_v3 = vsel %vm830_vm0, %v636_v1, 0.0  ;;  %vm211_vm0 = vcmp.lt.s32.totalorder %v207_v25, 16  ;;  %vm501_vm6 = vmpackc.low %vm663_vm7, %vm684_vm14  ;;  %vm854_vm14 = vcmp.lt.s32.totalorder %v659_v20, 16 }
  0x14   : > { %v552_v4 = vpack.i.bf16 %v224_v3, %v223_v2  ;;  %vm723_vm2 = vmand %vm654_vm5, %vm200_vm1 }
  0x16   : > { %553 = vrot.lane.b32.xlu1 %v552_v4, %s588_s18  ;;  %543 = vrot.lane.b32.xlu0 %v552_v4, %s589_s19 }
  0x1a   : > { %558 = vrot.lane.b32.xlu1 %v552_v4, %s590_s20  ;;  %548 = vrot.lane.b32.xlu0 %v552_v4, %s591_s21 }
  0x1e   : > { %563 = vrot.lane.b32.xlu0 %v552_v4, %s592_s22  ;;  %568 = vrot.lane.b32.xlu1 %v552_v4, %s593_s23 }
  0x22   : > { %573 = vrot.lane.b32.xlu0 %v552_v4, %s594_s24  ;;  %316 = vrot.lane.b32.xlu1 %v223_v2, %s595_s25 }
  0x26   : > { %318 = vrot.lane.b32.xlu0 %v224_v3, %s595_s25  ;;  %333 = vperm.xlu1 %577, %v330_v6  }
  0x88   : > { %v554_v21 = vpop.permute.xlu1 %553  ;;  %v544_v22 = vpop.permute.xlu0 %543 }
  0x89   : > { %v556_v26 = vunpack.i.h.bf16 %v554_v21  ;;  %v555_v27 = vunpack.i.l.bf16 %v554_v21  ;;  %v546_v28 = vunpack.i.h.bf16 %v544_v22  ;;  %v545_v29 = vunpack.i.l.bf16 %v544_v22 }
  0x8b   : > { %v256_v39 = vsel %vm255_vm10, %v555_v27, %v556_v26  ;;  %v230_v40 = vsel %vm229_vm11, %v545_v29, %v546_v28  ;;  %v231_v44 = vsel %vm229_vm11, %v546_v28, %v545_v29  ;;  %vm731_vm11 = vmpackc.low %vm189_vm8, %vm702_vm3  ;;  %v257_v56 = vsel %vm255_vm10, %v556_v26, %v555_v27 }
  0x8c   : > { %v559_v31 = vpop.permute.xlu1 %558  ;;  %v549_v32 = vpop.permute.xlu0 %548  ;;  %vm747_vm3 = vmand %vm209_vm4, %vm211_vm0  ;;  %vm208_vm0 = vcmp.ge.s32.totalorder %v206_v34, 0 }
  0x8d   : > { %v561_v35 = vunpack.i.h.bf16 %v559_v31  ;;  %v560_v36 = vunpack.i.l.bf16 %v559_v31  ;;  %v551_v37 = vunpack.i.h.bf16 %v549_v32  ;;  %v550_v38 = vunpack.i.l.bf16 %v549_v32  ;;  %vm849_vm10 = vmpackc.low %vm654_vm5, %vm672_vm9 }
  0x8e   : > { %vm307_vm5 = vcmp.lt.s32.totalorder %v645_v9, 112  ;;  %vm853_vm9 = vcmask 1043456  }
  0x8f   : > { %v269_v42 = vsel %vm268_vm13, %v560_v36, %v561_v35  ;;  %v243_v43 = vsel %vm242_vm15, %v550_v38, %v551_v37  ;;  %v244_v45 = vsel %vm242_vm15, %v551_v37, %v550_v38  ;;  %v270_v57 = vsel %vm268_vm13, %v561_v35, %v560_v36 }
  0x90   : > { %v500_v46 = vpack.c.bf16 %v243_v43, %v230_v40  ;;  %v503_v47 = vpack.c.bf16 %v244_v45, %v231_v44  ;;  %v564_v48 = vpop.permute.xlu0 %563  ;;  %v569_v50 = vpop.permute.xlu1 %568  ;;  %v506_v58 = vpack.c.bf16 %v269_v42, %v256_v39  ;;  %vm294_vm15 = vcmp.lt.s32.totalorder %v645_v9, 113 }
  0x91   : > { %v566_v51 = vunpack.i.h.bf16 %v564_v48  ;;  %v565_v52 = vunpack.i.l.bf16 %v564_v48  ;;  %v571_v54 = vunpack.i.h.bf16 %v569_v50  ;;  %v570_v55 = vunpack.i.l.bf16 %v569_v50 }
  0x92   : > { %502 = vmatprep.subr.msk.bf16.mxu0 %vm501_vm6, %v500_v46  ;;  %vm850_vm6 = vcmp.ge.s32.totalorder %v650_v17, 0  ;;  %vm210_vm13 = vcmp.lt.s32.totalorder %v206_v34, 16  ;;  %v509_v3 = vpack.c.bf16 %v270_v57, %v257_v56 }
  0x93   : > { %505 = vmatpush1.bf16.msk.msra.mxu0 %vm849_vm10, %v503_v47  ;;  %v283_v60 = vsel %vm281_vm12, %v566_v51, %v565_v52  ;;  %vm762_vm7 = vmpackc.low %vm850_vm6, %vm723_vm2  ;;  %v282_v62 = vsel %vm281_vm12, %v565_v52, %v566_v51  ;;  %v296_v4 = vsel %vm294_vm15, %v571_v54, %v570_v55  ;;  %v295_v11 = vsel %vm294_vm15, %v570_v55, %v571_v54 }
  0x94   : > { %v512_v63 = vpack.c.bf16 %v283_v60, %v636_v1  ;;  %508 = vmatprep.subr.msk.bf16.mxu0 %vm731_vm11, %v506_v58  ;;  %v574_v2 = vpop.permute.xlu0 %573  ;;  %vm513_vm2 = vmpackc.low %vm854_vm14, %vm853_vm9  ;;  %v515_v8 = vpack.c.bf16 %v282_v62, %v632_v0  ;;  %v317_v0 = vpop.permute.xlu1 %316 }
  0x95   : > { %v576_v5 = vunpack.i.h.bf16 %v574_v2  ;;  %v575_v6 = vunpack.i.l.bf16 %v574_v2  ;;  %vm781_vm12 = vmand %vm747_vm3, %vm189_vm8 }
  0x96   : > { %vm785_vm4 = vmand %vm208_vm0, %vm210_vm13  ;;  %vm320_vm0 = vcmp.lt.s32.totalorder %v645_v9, 111  ;;  %v329_v9 = vld [vmem:[%s827_s1] sm:$0xff] }
  0x97   : > { %511 = vmatpush1.bf16.msk.msra.mxu0 %vm762_vm7, %v509_v3  ;;  %v309_v10 = vsel %vm307_vm5, %v576_v5, %v575_v6  ;;  %vm859_vm11 = vmmov %vm853_vm9  ;;  %v308_v12 = vsel %vm307_vm5, %v575_v6, %v576_v5 }
  0x98   : > { %vm516_vm10 = vmpackc.low %vm200_vm1, %vm859_vm11  ;;  %v518_v13 = vpack.c.bf16 %v309_v10, %v296_v4  ;;  %514 = vmatprep.subr.msk.bf16.mxu0 %vm513_vm2, %v512_v63  ;;  %v319_v14 = vpop.permute.xlu0 %318  ;;  %v521_v15 = vpack.c.bf16 %v308_v12, %v295_v11 }
  0x99   : > { %vm519_vm8 = vmpackc.low %vm747_vm3, %vm781_vm12  ;;  %v322_v16 = vsel %vm320_vm0, %v319_v14, %v317_v0  ;;  %v321_v17 = vsel %vm320_vm0, %v317_v0, %v319_v14 }
  0x9a   : > { %vm214_vm7 = vmand %vm785_vm4, %vm850_vm6 }
  0x9b   : > { %517 = vmatpush1.bf16.msk.msra.mxu0 %vm516_vm10, %v515_v8  ;;  %vm522_vm15 = vmpackc.low %vm785_vm4, %vm214_vm7 }
  0x9c   : > { %520 = vmatprep.subr.msk.bf16.mxu0 %vm519_vm8, %v518_v13  ;;  %vm860_vm13 = vmmov %vm854_vm14  ;;  %vm336_vm14 = vcmask 588800  }
  0x9d   : > { %vm217_vm5 = vmand %vm747_vm3, %vm860_vm13 }
  0x9e   : > { %vm216_vm9 = vmand %vm785_vm4, %vm200_vm1 }
  0x9f   : > { %523 = vmatpush1.bf16.msk.msra.mxu0 %vm522_vm15, %v521_v15 }
  0xa0   : > { %493 = vmatprep.subr.msk.mxu0 %vm217_vm5, %v322_v16 }
  0xa3   : > { %494 = vmatpush1.msk.msra.mxu0 %vm216_vm9, %v321_v17 }
  0xa4   : > { %495 = vmatmul.mubr.msk.f32.vlgmr.msra.gmra.mrb[0].mxu0 %vm336_vm14, %v329_v9 }
  0xa5   : > { %v334_v18 = vpop.permute.xlu1 %333 }
 0x177   : > { %v406_v19 = vpop.f32.mrb[0].mxu0 }
 0x178   : > { %v407_v20 = vadd.f32 %v406_v19, %v334_v18  ;;  %v408_v21 = vpop.f32.mrb[1].mxu0 }
 0x179   : > { %v409_v22 = vadd.f32 %v408_v21, %v334_v18 }
 0x17a   : > { %411 = vst [vmem:[%s170_s6] sm:$0xff] %v407_v20 }
 0x17b   : > { %412 = vst [vmem:[%s170_s6 + $0x8] sm:$0xff] %v409_v22 }
 0x17c PF: > { %s13_s12 = sadd.s32 1, %s586_s12  }
 0x17d   : > { %p10_p4 = scmp.ge.s32.totalorder %s13_s12, 4  }
 0x17f   :  { %12 = sbr.rel (!%p10_p4) target bundleno = 1 (0x1), region = 62 }

</bundles_post_ra>
